<compile_context>
chip_gen: v5e
topology: v5e:2x2
jax: 0.10.0
libtpu: 0.0.40
codegen_flags: <defaults>
</compile_context>

<pallas_src>
import jax
import jax.numpy as jnp
from jax import lax
from jax.experimental import pallas as pl
from jax.experimental.pallas import tpu as pltpu


def additive_attention_kernel(valid_lens_ref,   # SMEM (B,) int32   (scalar prefetch)
                              q_ref,            # VMEM (Bb, Q, Dq)
                              kt_ref,           # VMEM (Bb, Dk, K)  keys pre-transposed
                              v_ref,            # VMEM (Bb, K, Dv)
                              wq_ref,           # VMEM (Dq, H)      W_q pre-transposed
                              wk_ref,           # VMEM (H, Dk)      W_k original layout
                              wv_ref,           # SMEM (H,)         w_v flattened
                              out_ref):         # VMEM (Bb, Q, Dv)
    i = pl.program_id(0)
    Bb, Q, Dq = q_ref.shape
    K = kt_ref.shape[2]
    H = wq_ref.shape[1]

    # One MXU matmul for the whole batch block: (Bb*Q, Dq) @ (Dq, H).
    q2 = q_ref[...].reshape(Bb * Q, Dq)
    q_proj = jnp.dot(q2, wq_ref[...], preferred_element_type=jnp.float32)    # (Bb*Q, H)

    wk = wk_ref[...]                                                         # (H, Dk)

    for b in range(Bb):                 # static unroll over the batch block
        # k_proj^T with K on the lane axis: (H, Dk) @ (Dk, K) -> (H, K).
        kpT = jnp.dot(wk, kt_ref[b], preferred_element_type=jnp.float32)     # (H, K)
        qp_b = q_proj[b * Q:(b + 1) * Q, :]                                  # (Q, H)

        # scores[q, k] = sum_h w_v[h] * tanh(q_proj[q, h] + k_proj[k, h]),
        # accumulated in a (Q, K) tile -- no (Q, K, H) intermediate.
        scores = jnp.zeros((Q, K), jnp.float32)
        for h in range(H):
            scores = scores + wv_ref[h] * jnp.tanh(
                qp_b[:, h:h + 1] + kpT[h:h + 1, :])

        # Masked softmax over the key (lane) axis; masked entries are SET to
        # -1e6, exactly like sequence_mask(..., value=-1e6) + softmax.
        vl = valid_lens_ref[i * Bb + b]
        k_idx = lax.broadcasted_iota(jnp.int32, (Q, K), 1)
        scores = jnp.where(k_idx < vl, scores, jnp.float32(-1.0e6))
        m = jnp.max(scores, axis=-1, keepdims=True)
        e = jnp.exp(scores - m)
        denom = jnp.sum(e, axis=-1, keepdims=True)
        # Exact reciprocal: approx=True (EUP) would inject ~1e-4 rel. error,
        # and the divide is O(Q*K) vs O(Q*K*H) tanh, so it is not the bottleneck.
        attn = e * pl.reciprocal(denom, approx=False)                        # (Q, K)

        # Dropout is identity in eval mode; final bmm with values on the MXU.
        out_ref[b] = jnp.dot(attn, v_ref[b],
                             preferred_element_type=jnp.float32).astype(out_ref.dtype)


def _pick_block_b(B, max_block=8):
    """Largest divisor of B that is <= max_block while leaving >= 2 grid steps
    (so both v7x TensorCores get work); falls back to 1."""
    best = 1
    for cand in range(1, min(B, max_block) + 1):
        if B % cand == 0 and (B // cand >= 2 or B == cand == 1):
            best = cand
    return best


def d2l_additive_attention(queries, keys, values, valid_lens, w_q, w_k, w_v,
                           *, block_b=None):
    """queries: (B,Q,Dq), keys: (B,K,Dk), values: (B,K,Dv), valid_lens: (B,) int.
    w_q: (H,Dq), w_k: (H,Dk), w_v: (1,H)  -- PyTorch nn.Linear layouts."""
    B, Q, Dq = queries.shape
    _, K, Dk = keys.shape
    _, _, Dv = values.shape
    H = w_q.shape[0]

    if block_b is None:
        block_b = _pick_block_b(B)
    assert B % block_b == 0, "block_b must divide B"
    grid = (B // block_b,)

    # One-time wrapper-side re-layouts (fused XLA ops, never repeated per step):
    keys_t = jnp.swapaxes(keys, 1, 2)     # (B, Dk, K): K lane-dense inside kernel
    wq_t = w_q.T                          # (Dq, H): plain (untransposed) MXU feed
    wv_flat = w_v.reshape(-1)             # (H,): SMEM scalar reads

    grid_spec = pltpu.PrefetchScalarGridSpec(
        num_scalar_prefetch=1,            # valid_lens lands in SMEM
        grid=grid,
        in_specs=[
            pl.BlockSpec((block_b, Q, Dq), lambda i, vl: (i, 0, 0)),  # queries
            pl.BlockSpec((block_b, Dk, K), lambda i, vl: (i, 0, 0)),  # keys (transposed)
            pl.BlockSpec((block_b, K, Dv), lambda i, vl: (i, 0, 0)),  # values
            pl.BlockSpec((Dq, H), lambda i, vl: (0, 0)),              # W_q^T (resident)
            pl.BlockSpec((H, Dk), lambda i, vl: (0, 0)),              # W_k   (resident)
            pl.BlockSpec(memory_space=pltpu.MemorySpace.SMEM),        # w_v   (SMEM)
        ],
        out_specs=pl.BlockSpec((block_b, Q, Dv), lambda i, vl: (i, 0, 0)),
    )

    return pl.pallas_call(
        additive_attention_kernel,
        out_shape=jax.ShapeDtypeStruct((B, Q, Dv), queries.dtype),
        grid_spec=grid_spec,
        compiler_params=pltpu.CompilerParams(dimension_semantics=("parallel",)),
    )(valid_lens.astype(jnp.int32), queries, keys_t, values, wq_t, w_k, wv_flat)


def reference_additive_attention(queries, keys, values, valid_lens, w_q, w_k, w_v):
    """Pure-JAX reference mirroring the PyTorch forward (eval mode)."""
    q_proj = queries @ w_q.T
    k_proj = keys @ w_k.T
    feats = jnp.tanh(q_proj[:, :, None, :] + k_proj[:, None, :, :])
    scores = jnp.squeeze(feats @ w_v.T, -1)                        # (B, Q, K)
    k_idx = jnp.arange(scores.shape[-1])
    mask = k_idx[None, None, :] < valid_lens[:, None, None]
    scores = jnp.where(mask, scores, -1.0e6)
    attn = jax.nn.softmax(scores, axis=-1)
    return attn @ values


if __name__ == "__main__":
    B, Q, K = 2, 8, 16
    Dq, Dk, Dv, H = 32, 32, 32, 32
    dropout = 0.0  # eval mode -> dropout is identity

    key = jax.random.PRNGKey(0)
    kq, kk, kv, kwq, kwk, kwv = jax.random.split(key, 6)

    queries = jax.random.normal(kq, (B, Q, Dq), dtype=jnp.float32)
    keys_ = jax.random.normal(kk, (B, K, Dk), dtype=jnp.float32)
    values = jax.random.normal(kv, (B, K, Dv), dtype=jnp.float32)
    valid_lens = jnp.array([5, 12], dtype=jnp.int32)

    # Deterministic parameters (nn.Linear weight shape = (out_features, in_features))
    w_q = 0.1 * jax.random.normal(kwq, (H, Dq), dtype=jnp.float32)
    w_k = 0.1 * jax.random.normal(kwk, (H, Dk), dtype=jnp.float32)
    w_v = 0.1 * jax.random.normal(kwv, (1, H), dtype=jnp.float32)

    out = d2l_additive_attention(queries, keys_, values, valid_lens, w_q, w_k, w_v)
    out = jax.block_until_ready(out)

    ref = reference_additive_attention(queries, keys_, values, valid_lens, w_q, w_k, w_v)
    assert out.shape == (B, Q, Dv)
    assert jnp.allclose(out, ref, rtol=1e-5, atol=1e-5), "mismatch vs. JAX reference"

    print("KERNEL_OK")
</pallas_src>

<mosaic_0001>
module attributes {stable_mosaic.version = 11 : i64} {
  func.func @additive_attention_kernel(%arg0: i32, %arg1: memref<2xi32, #tpu.memory_space<smem>>, %arg2: memref<1x8x32xf32, #tpu.memory_space<vmem>>, %arg3: memref<1x32x16xf32, #tpu.memory_space<vmem>>, %arg4: memref<1x16x32xf32, #tpu.memory_space<vmem>>, %arg5: memref<32x32xf32, #tpu.memory_space<vmem>>, %arg6: memref<32x32xf32, #tpu.memory_space<vmem>>, %arg7: memref<32xf32, #tpu.memory_space<smem>>, %arg8: memref<1x8x32xf32, #tpu.memory_space<vmem>>) attributes {dimension_semantics = [#tpu.dimension_semantics<parallel>], iteration_bounds = array<i64: 2>, scalar_prefetch = 1 : i64, scratch_operands = 0 : i64, tpu.core_type = #tpu.core_type<tc>, window_params = [{transform_indices = @transform_0, window_bounds = array<i64: 1, 8, 32>}, {transform_indices = @transform_1, window_bounds = array<i64: 1, 32, 16>}, {transform_indices = @transform_2, window_bounds = array<i64: 1, 16, 32>}, {pipeline_mode = #tpu.pipeline_mode<synchronous>, transform_indices = @transform_3, window_bounds = array<i64: 32, 32>}, {pipeline_mode = #tpu.pipeline_mode<synchronous>, transform_indices = @transform_4, window_bounds = array<i64: 32, 32>}, {transform_indices = @transform_5, window_bounds = array<i64: 32>}, {transform_indices = @transform_6, window_bounds = array<i64: 1, 8, 32>}]} {
    %c0 = arith.constant 0 : index
    %c0_0 = arith.constant 0 : index
    %c0_1 = arith.constant 0 : index
    %0 = vector.load %arg2[%c0, %c0_0, %c0_1] : memref<1x8x32xf32, #tpu.memory_space<vmem>>, vector<1x8x32xf32>
    %1 = vector.shape_cast %0 : vector<1x8x32xf32> to vector<8x32xf32>
    %c0_2 = arith.constant 0 : index
    %c0_3 = arith.constant 0 : index
    %2 = vector.load %arg5[%c0_2, %c0_3] : memref<32x32xf32, #tpu.memory_space<vmem>>, vector<32x32xf32>
    %cst = arith.constant dense<0.000000e+00> : vector<8x32xf32>
    %3 = tpu.matmul %1, %2, %cst {dimension_numbers = #tpu.dot_dimension_numbers<[1], [0], [0], [1], [0, 0, 1, 1], [], []>} : vector<8x32xf32>, vector<32x32xf32>, vector<8x32xf32> -> vector<8x32xf32>
    %c0_4 = arith.constant 0 : index
    %c0_5 = arith.constant 0 : index
    %4 = vector.load %arg6[%c0_4, %c0_5] : memref<32x32xf32, #tpu.memory_space<vmem>>, vector<32x32xf32>
    %c0_6 = arith.constant 0 : index
    %c0_7 = arith.constant 0 : index
    %c0_8 = arith.constant 0 : index
    %5 = vector.load %arg3[%c0_6, %c0_7, %c0_8] : memref<1x32x16xf32, #tpu.memory_space<vmem>>, vector<1x32x16xf32>
    %6 = vector.shape_cast %5 : vector<1x32x16xf32> to vector<32x16xf32>
    %cst_9 = arith.constant dense<0.000000e+00> : vector<32x16xf32>
    %7 = tpu.matmul %4, %6, %cst_9 {dimension_numbers = #tpu.dot_dimension_numbers<[1], [0], [0], [1], [0, 0, 1, 1], [], []>} : vector<32x32xf32>, vector<32x16xf32>, vector<32x16xf32> -> vector<32x16xf32>
    %cst_10 = arith.constant 0.000000e+00 : f32
    %8 = vector.broadcast %cst_10 : f32 to vector<8x16xf32>
    %c0_11 = arith.constant 0 : index
    %9 = memref.load %arg7[%c0_11] : memref<32xf32, #tpu.memory_space<smem>>
    %10 = vector.extract_strided_slice %3 {offsets = [0, 0], sizes = [8, 1], strides = [1, 1]} : vector<8x32xf32> to vector<8x1xf32>
    %11 = vector.extract_strided_slice %7 {offsets = [0, 0], sizes = [1, 16], strides = [1, 1]} : vector<32x16xf32> to vector<1x16xf32>
    %12 = vector.broadcast %10 : vector<8x1xf32> to vector<8x16xf32>
    %13 = vector.broadcast %11 : vector<1x16xf32> to vector<8x16xf32>
    %14 = arith.addf %12, %13 : vector<8x16xf32>
    %15 = math.tanh %14 : vector<8x16xf32>
    %16 = vector.broadcast %9 : f32 to vector<8x16xf32>
    %17 = arith.mulf %16, %15 : vector<8x16xf32>
    %18 = arith.addf %8, %17 : vector<8x16xf32>
    %c1 = arith.constant 1 : index
    %19 = memref.load %arg7[%c1] : memref<32xf32, #tpu.memory_space<smem>>
    %20 = vector.extract_strided_slice %3 {offsets = [0, 1], sizes = [8, 1], strides = [1, 1]} : vector<8x32xf32> to vector<8x1xf32>
    %21 = vector.extract_strided_slice %7 {offsets = [1, 0], sizes = [1, 16], strides = [1, 1]} : vector<32x16xf32> to vector<1x16xf32>
    %22 = vector.broadcast %20 : vector<8x1xf32> to vector<8x16xf32>
    %23 = vector.broadcast %21 : vector<1x16xf32> to vector<8x16xf32>
    %24 = arith.addf %22, %23 : vector<8x16xf32>
    %25 = math.tanh %24 : vector<8x16xf32>
    %26 = vector.broadcast %19 : f32 to vector<8x16xf32>
    %27 = arith.mulf %26, %25 : vector<8x16xf32>
    %28 = arith.addf %18, %27 : vector<8x16xf32>
    %c2 = arith.constant 2 : index
    %29 = memref.load %arg7[%c2] : memref<32xf32, #tpu.memory_space<smem>>
    %30 = vector.extract_strided_slice %3 {offsets = [0, 2], sizes = [8, 1], strides = [1, 1]} : vector<8x32xf32> to vector<8x1xf32>
    %31 = vector.extract_strided_slice %7 {offsets = [2, 0], sizes = [1, 16], strides = [1, 1]} : vector<32x16xf32> to vector<1x16xf32>
    %32 = vector.broadcast %30 : vector<8x1xf32> to vector<8x16xf32>
    %33 = vector.broadcast %31 : vector<1x16xf32> to vector<8x16xf32>
    %34 = arith.addf %32, %33 : vector<8x16xf32>
    %35 = math.tanh %34 : vector<8x16xf32>
    %36 = vector.broadcast %29 : f32 to vector<8x16xf32>
    %37 = arith.mulf %36, %35 : vector<8x16xf32>
    %38 = arith.addf %28, %37 : vector<8x16xf32>
    %c3 = arith.constant 3 : index
    %39 = memref.load %arg7[%c3] : memref<32xf32, #tpu.memory_space<smem>>
    %40 = vector.extract_strided_slice %3 {offsets = [0, 3], sizes = [8, 1], strides = [1, 1]} : vector<8x32xf32> to vector<8x1xf32>
    %41 = vector.extract_strided_slice %7 {offsets = [3, 0], sizes = [1, 16], strides = [1, 1]} : vector<32x16xf32> to vector<1x16xf32>
    %42 = vector.broadcast %40 : vector<8x1xf32> to vector<8x16xf32>
    %43 = vector.broadcast %41 : vector<1x16xf32> to vector<8x16xf32>
    %44 = arith.addf %42, %43 : vector<8x16xf32>
    %45 = math.tanh %44 : vector<8x16xf32>
    %46 = vector.broadcast %39 : f32 to vector<8x16xf32>
    %47 = arith.mulf %46, %45 : vector<8x16xf32>
    %48 = arith.addf %38, %47 : vector<8x16xf32>
    %c4 = arith.constant 4 : index
    %49 = memref.load %arg7[%c4] : memref<32xf32, #tpu.memory_space<smem>>
    %50 = vector.extract_strided_slice %3 {offsets = [0, 4], sizes = [8, 1], strides = [1, 1]} : vector<8x32xf32> to vector<8x1xf32>
    %51 = vector.extract_strided_slice %7 {offsets = [4, 0], sizes = [1, 16], strides = [1, 1]} : vector<32x16xf32> to vector<1x16xf32>
    %52 = vector.broadcast %50 : vector<8x1xf32> to vector<8x16xf32>
    %53 = vector.broadcast %51 : vector<1x16xf32> to vector<8x16xf32>
    %54 = arith.addf %52, %53 : vector<8x16xf32>
    %55 = math.tanh %54 : vector<8x16xf32>
    %56 = vector.broadcast %49 : f32 to vector<8x16xf32>
    %57 = arith.mulf %56, %55 : vector<8x16xf32>
    %58 = arith.addf %48, %57 : vector<8x16xf32>
    %c5 = arith.constant 5 : index
    %59 = memref.load %arg7[%c5] : memref<32xf32, #tpu.memory_space<smem>>
    %60 = vector.extract_strided_slice %3 {offsets = [0, 5], sizes = [8, 1], strides = [1, 1]} : vector<8x32xf32> to vector<8x1xf32>
    %61 = vector.extract_strided_slice %7 {offsets = [5, 0], sizes = [1, 16], strides = [1, 1]} : vector<32x16xf32> to vector<1x16xf32>
    %62 = vector.broadcast %60 : vector<8x1xf32> to vector<8x16xf32>
    %63 = vector.broadcast %61 : vector<1x16xf32> to vector<8x16xf32>
    %64 = arith.addf %62, %63 : vector<8x16xf32>
    %65 = math.tanh %64 : vector<8x16xf32>
    %66 = vector.broadcast %59 : f32 to vector<8x16xf32>
    %67 = arith.mulf %66, %65 : vector<8x16xf32>
    %68 = arith.addf %58, %67 : vector<8x16xf32>
    %c6 = arith.constant 6 : index
    %69 = memref.load %arg7[%c6] : memref<32xf32, #tpu.memory_space<smem>>
    %70 = vector.extract_strided_slice %3 {offsets = [0, 6], sizes = [8, 1], strides = [1, 1]} : vector<8x32xf32> to vector<8x1xf32>
    %71 = vector.extract_strided_slice %7 {offsets = [6, 0], sizes = [1, 16], strides = [1, 1]} : vector<32x16xf32> to vector<1x16xf32>
    %72 = vector.broadcast %70 : vector<8x1xf32> to vector<8x16xf32>
    %73 = vector.broadcast %71 : vector<1x16xf32> to vector<8x16xf32>
    %74 = arith.addf %72, %73 : vector<8x16xf32>
    %75 = math.tanh %74 : vector<8x16xf32>
    %76 = vector.broadcast %69 : f32 to vector<8x16xf32>
    %77 = arith.mulf %76, %75 : vector<8x16xf32>
    %78 = arith.addf %68, %77 : vector<8x16xf32>
    %c7 = arith.constant 7 : index
    %79 = memref.load %arg7[%c7] : memref<32xf32, #tpu.memory_space<smem>>
    %80 = vector.extract_strided_slice %3 {offsets = [0, 7], sizes = [8, 1], strides = [1, 1]} : vector<8x32xf32> to vector<8x1xf32>
    %81 = vector.extract_strided_slice %7 {offsets = [7, 0], sizes = [1, 16], strides = [1, 1]} : vector<32x16xf32> to vector<1x16xf32>
    %82 = vector.broadcast %80 : vector<8x1xf32> to vector<8x16xf32>
    %83 = vector.broadcast %81 : vector<1x16xf32> to vector<8x16xf32>
    %84 = arith.addf %82, %83 : vector<8x16xf32>
    %85 = math.tanh %84 : vector<8x16xf32>
    %86 = vector.broadcast %79 : f32 to vector<8x16xf32>
    %87 = arith.mulf %86, %85 : vector<8x16xf32>
    %88 = arith.addf %78, %87 : vector<8x16xf32>
    %c8 = arith.constant 8 : index
    %89 = memref.load %arg7[%c8] : memref<32xf32, #tpu.memory_space<smem>>
    %90 = vector.extract_strided_slice %3 {offsets = [0, 8], sizes = [8, 1], strides = [1, 1]} : vector<8x32xf32> to vector<8x1xf32>
    %91 = vector.extract_strided_slice %7 {offsets = [8, 0], sizes = [1, 16], strides = [1, 1]} : vector<32x16xf32> to vector<1x16xf32>
    %92 = vector.broadcast %90 : vector<8x1xf32> to vector<8x16xf32>
    %93 = vector.broadcast %91 : vector<1x16xf32> to vector<8x16xf32>
    %94 = arith.addf %92, %93 : vector<8x16xf32>
    %95 = math.tanh %94 : vector<8x16xf32>
    %96 = vector.broadcast %89 : f32 to vector<8x16xf32>
    %97 = arith.mulf %96, %95 : vector<8x16xf32>
    %98 = arith.addf %88, %97 : vector<8x16xf32>
    %c9 = arith.constant 9 : index
    %99 = memref.load %arg7[%c9] : memref<32xf32, #tpu.memory_space<smem>>
    %100 = vector.extract_strided_slice %3 {offsets = [0, 9], sizes = [8, 1], strides = [1, 1]} : vector<8x32xf32> to vector<8x1xf32>
    %101 = vector.extract_strided_slice %7 {offsets = [9, 0], sizes = [1, 16], strides = [1, 1]} : vector<32x16xf32> to vector<1x16xf32>
    %102 = vector.broadcast %100 : vector<8x1xf32> to vector<8x16xf32>
    %103 = vector.broadcast %101 : vector<1x16xf32> to vector<8x16xf32>
    %104 = arith.addf %102, %103 : vector<8x16xf32>
    %105 = math.tanh %104 : vector<8x16xf32>
    %106 = vector.broadcast %99 : f32 to vector<8x16xf32>
    %107 = arith.mulf %106, %105 : vector<8x16xf32>
    %108 = arith.addf %98, %107 : vector<8x16xf32>
    %c10 = arith.constant 10 : index
    %109 = memref.load %arg7[%c10] : memref<32xf32, #tpu.memory_space<smem>>
    %110 = vector.extract_strided_slice %3 {offsets = [0, 10], sizes = [8, 1], strides = [1, 1]} : vector<8x32xf32> to vector<8x1xf32>
    %111 = vector.extract_strided_slice %7 {offsets = [10, 0], sizes = [1, 16], strides = [1, 1]} : vector<32x16xf32> to vector<1x16xf32>
    %112 = vector.broadcast %110 : vector<8x1xf32> to vector<8x16xf32>
    %113 = vector.broadcast %111 : vector<1x16xf32> to vector<8x16xf32>
    %114 = arith.addf %112, %113 : vector<8x16xf32>
    %115 = math.tanh %114 : vector<8x16xf32>
    %116 = vector.broadcast %109 : f32 to vector<8x16xf32>
    %117 = arith.mulf %116, %115 : vector<8x16xf32>
    %118 = arith.addf %108, %117 : vector<8x16xf32>
    %c11 = arith.constant 11 : index
    %119 = memref.load %arg7[%c11] : memref<32xf32, #tpu.memory_space<smem>>
    %120 = vector.extract_strided_slice %3 {offsets = [0, 11], sizes = [8, 1], strides = [1, 1]} : vector<8x32xf32> to vector<8x1xf32>
    %121 = vector.extract_strided_slice %7 {offsets = [11, 0], sizes = [1, 16], strides = [1, 1]} : vector<32x16xf32> to vector<1x16xf32>
    %122 = vector.broadcast %120 : vector<8x1xf32> to vector<8x16xf32>
    %123 = vector.broadcast %121 : vector<1x16xf32> to vector<8x16xf32>
    %124 = arith.addf %122, %123 : vector<8x16xf32>
    %125 = math.tanh %124 : vector<8x16xf32>
    %126 = vector.broadcast %119 : f32 to vector<8x16xf32>
    %127 = arith.mulf %126, %125 : vector<8x16xf32>
    %128 = arith.addf %118, %127 : vector<8x16xf32>
    %c12 = arith.constant 12 : index
    %129 = memref.load %arg7[%c12] : memref<32xf32, #tpu.memory_space<smem>>
    %130 = vector.extract_strided_slice %3 {offsets = [0, 12], sizes = [8, 1], strides = [1, 1]} : vector<8x32xf32> to vector<8x1xf32>
    %131 = vector.extract_strided_slice %7 {offsets = [12, 0], sizes = [1, 16], strides = [1, 1]} : vector<32x16xf32> to vector<1x16xf32>
    %132 = vector.broadcast %130 : vector<8x1xf32> to vector<8x16xf32>
    %133 = vector.broadcast %131 : vector<1x16xf32> to vector<8x16xf32>
    %134 = arith.addf %132, %133 : vector<8x16xf32>
    %135 = math.tanh %134 : vector<8x16xf32>
    %136 = vector.broadcast %129 : f32 to vector<8x16xf32>
    %137 = arith.mulf %136, %135 : vector<8x16xf32>
    %138 = arith.addf %128, %137 : vector<8x16xf32>
    %c13 = arith.constant 13 : index
    %139 = memref.load %arg7[%c13] : memref<32xf32, #tpu.memory_space<smem>>
    %140 = vector.extract_strided_slice %3 {offsets = [0, 13], sizes = [8, 1], strides = [1, 1]} : vector<8x32xf32> to vector<8x1xf32>
    %141 = vector.extract_strided_slice %7 {offsets = [13, 0], sizes = [1, 16], strides = [1, 1]} : vector<32x16xf32> to vector<1x16xf32>
    %142 = vector.broadcast %140 : vector<8x1xf32> to vector<8x16xf32>
    %143 = vector.broadcast %141 : vector<1x16xf32> to vector<8x16xf32>
    %144 = arith.addf %142, %143 : vector<8x16xf32>
    %145 = math.tanh %144 : vector<8x16xf32>
    %146 = vector.broadcast %139 : f32 to vector<8x16xf32>
    %147 = arith.mulf %146, %145 : vector<8x16xf32>
    %148 = arith.addf %138, %147 : vector<8x16xf32>
    %c14 = arith.constant 14 : index
    %149 = memref.load %arg7[%c14] : memref<32xf32, #tpu.memory_space<smem>>
    %150 = vector.extract_strided_slice %3 {offsets = [0, 14], sizes = [8, 1], strides = [1, 1]} : vector<8x32xf32> to vector<8x1xf32>
    %151 = vector.extract_strided_slice %7 {offsets = [14, 0], sizes = [1, 16], strides = [1, 1]} : vector<32x16xf32> to vector<1x16xf32>
    %152 = vector.broadcast %150 : vector<8x1xf32> to vector<8x16xf32>
    %153 = vector.broadcast %151 : vector<1x16xf32> to vector<8x16xf32>
    %154 = arith.addf %152, %153 : vector<8x16xf32>
    %155 = math.tanh %154 : vector<8x16xf32>
    %156 = vector.broadcast %149 : f32 to vector<8x16xf32>
    %157 = arith.mulf %156, %155 : vector<8x16xf32>
    %158 = arith.addf %148, %157 : vector<8x16xf32>
    %c15 = arith.constant 15 : index
    %159 = memref.load %arg7[%c15] : memref<32xf32, #tpu.memory_space<smem>>
    %160 = vector.extract_strided_slice %3 {offsets = [0, 15], sizes = [8, 1], strides = [1, 1]} : vector<8x32xf32> to vector<8x1xf32>
    %161 = vector.extract_strided_slice %7 {offsets = [15, 0], sizes = [1, 16], strides = [1, 1]} : vector<32x16xf32> to vector<1x16xf32>
    %162 = vector.broadcast %160 : vector<8x1xf32> to vector<8x16xf32>
    %163 = vector.broadcast %161 : vector<1x16xf32> to vector<8x16xf32>
    %164 = arith.addf %162, %163 : vector<8x16xf32>
    %165 = math.tanh %164 : vector<8x16xf32>
    %166 = vector.broadcast %159 : f32 to vector<8x16xf32>
    %167 = arith.mulf %166, %165 : vector<8x16xf32>
    %168 = arith.addf %158, %167 : vector<8x16xf32>
    %c16 = arith.constant 16 : index
    %169 = memref.load %arg7[%c16] : memref<32xf32, #tpu.memory_space<smem>>
    %170 = vector.extract_strided_slice %3 {offsets = [0, 16], sizes = [8, 1], strides = [1, 1]} : vector<8x32xf32> to vector<8x1xf32>
    %171 = vector.extract_strided_slice %7 {offsets = [16, 0], sizes = [1, 16], strides = [1, 1]} : vector<32x16xf32> to vector<1x16xf32>
    %172 = vector.broadcast %170 : vector<8x1xf32> to vector<8x16xf32>
    %173 = vector.broadcast %171 : vector<1x16xf32> to vector<8x16xf32>
    %174 = arith.addf %172, %173 : vector<8x16xf32>
    %175 = math.tanh %174 : vector<8x16xf32>
    %176 = vector.broadcast %169 : f32 to vector<8x16xf32>
    %177 = arith.mulf %176, %175 : vector<8x16xf32>
    %178 = arith.addf %168, %177 : vector<8x16xf32>
    %c17 = arith.constant 17 : index
    %179 = memref.load %arg7[%c17] : memref<32xf32, #tpu.memory_space<smem>>
    %180 = vector.extract_strided_slice %3 {offsets = [0, 17], sizes = [8, 1], strides = [1, 1]} : vector<8x32xf32> to vector<8x1xf32>
    %181 = vector.extract_strided_slice %7 {offsets = [17, 0], sizes = [1, 16], strides = [1, 1]} : vector<32x16xf32> to vector<1x16xf32>
    %182 = vector.broadcast %180 : vector<8x1xf32> to vector<8x16xf32>
    %183 = vector.broadcast %181 : vector<1x16xf32> to vector<8x16xf32>
    %184 = arith.addf %182, %183 : vector<8x16xf32>
    %185 = math.tanh %184 : vector<8x16xf32>
    %186 = vector.broadcast %179 : f32 to vector<8x16xf32>
    %187 = arith.mulf %186, %185 : vector<8x16xf32>
    %188 = arith.addf %178, %187 : vector<8x16xf32>
    %c18 = arith.constant 18 : index
    %189 = memref.load %arg7[%c18] : memref<32xf32, #tpu.memory_space<smem>>
    %190 = vector.extract_strided_slice %3 {offsets = [0, 18], sizes = [8, 1], strides = [1, 1]} : vector<8x32xf32> to vector<8x1xf32>
    %191 = vector.extract_strided_slice %7 {offsets = [18, 0], sizes = [1, 16], strides = [1, 1]} : vector<32x16xf32> to vector<1x16xf32>
    %192 = vector.broadcast %190 : vector<8x1xf32> to vector<8x16xf32>
    %193 = vector.broadcast %191 : vector<1x16xf32> to vector<8x16xf32>
    %194 = arith.addf %192, %193 : vector<8x16xf32>
    %195 = math.tanh %194 : vector<8x16xf32>
    %196 = vector.broadcast %189 : f32 to vector<8x16xf32>
    %197 = arith.mulf %196, %195 : vector<8x16xf32>
    %198 = arith.addf %188, %197 : vector<8x16xf32>
    %c19 = arith.constant 19 : index
    %199 = memref.load %arg7[%c19] : memref<32xf32, #tpu.memory_space<smem>>
    %200 = vector.extract_strided_slice %3 {offsets = [0, 19], sizes = [8, 1], strides = [1, 1]} : vector<8x32xf32> to vector<8x1xf32>
    %201 = vector.extract_strided_slice %7 {offsets = [19, 0], sizes = [1, 16], strides = [1, 1]} : vector<32x16xf32> to vector<1x16xf32>
    %202 = vector.broadcast %200 : vector<8x1xf32> to vector<8x16xf32>
    %203 = vector.broadcast %201 : vector<1x16xf32> to vector<8x16xf32>
    %204 = arith.addf %202, %203 : vector<8x16xf32>
    %205 = math.tanh %204 : vector<8x16xf32>
    %206 = vector.broadcast %199 : f32 to vector<8x16xf32>
    %207 = arith.mulf %206, %205 : vector<8x16xf32>
    %208 = arith.addf %198, %207 : vector<8x16xf32>
    %c20 = arith.constant 20 : index
    %209 = memref.load %arg7[%c20] : memref<32xf32, #tpu.memory_space<smem>>
    %210 = vector.extract_strided_slice %3 {offsets = [0, 20], sizes = [8, 1], strides = [1, 1]} : vector<8x32xf32> to vector<8x1xf32>
    %211 = vector.extract_strided_slice %7 {offsets = [20, 0], sizes = [1, 16], strides = [1, 1]} : vector<32x16xf32> to vector<1x16xf32>
    %212 = vector.broadcast %210 : vector<8x1xf32> to vector<8x16xf32>
    %213 = vector.broadcast %211 : vector<1x16xf32> to vector<8x16xf32>
    %214 = arith.addf %212, %213 : vector<8x16xf32>
    %215 = math.tanh %214 : vector<8x16xf32>
    %216 = vector.broadcast %209 : f32 to vector<8x16xf32>
    %217 = arith.mulf %216, %215 : vector<8x16xf32>
    %218 = arith.addf %208, %217 : vector<8x16xf32>
    %c21 = arith.constant 21 : index
    %219 = memref.load %arg7[%c21] : memref<32xf32, #tpu.memory_space<smem>>
    %220 = vector.extract_strided_slice %3 {offsets = [0, 21], sizes = [8, 1], strides = [1, 1]} : vector<8x32xf32> to vector<8x1xf32>
    %221 = vector.extract_strided_slice %7 {offsets = [21, 0], sizes = [1, 16], strides = [1, 1]} : vector<32x16xf32> to vector<1x16xf32>
    %222 = vector.broadcast %220 : vector<8x1xf32> to vector<8x16xf32>
    %223 = vector.broadcast %221 : vector<1x16xf32> to vector<8x16xf32>
    %224 = arith.addf %222, %223 : vector<8x16xf32>
    %225 = math.tanh %224 : vector<8x16xf32>
    %226 = vector.broadcast %219 : f32 to vector<8x16xf32>
    %227 = arith.mulf %226, %225 : vector<8x16xf32>
    %228 = arith.addf %218, %227 : vector<8x16xf32>
    %c22 = arith.constant 22 : index
    %229 = memref.load %arg7[%c22] : memref<32xf32, #tpu.memory_space<smem>>
    %230 = vector.extract_strided_slice %3 {offsets = [0, 22], sizes = [8, 1], strides = [1, 1]} : vector<8x32xf32> to vector<8x1xf32>
    %231 = vector.extract_strided_slice %7 {offsets = [22, 0], sizes = [1, 16], strides = [1, 1]} : vector<32x16xf32> to vector<1x16xf32>
    %232 = vector.broadcast %230 : vector<8x1xf32> to vector<8x16xf32>
    %233 = vector.broadcast %231 : vector<1x16xf32> to vector<8x16xf32>
    %234 = arith.addf %232, %233 : vector<8x16xf32>
    %235 = math.tanh %234 : vector<8x16xf32>
    %236 = vector.broadcast %229 : f32 to vector<8x16xf32>
    %237 = arith.mulf %236, %235 : vector<8x16xf32>
    %238 = arith.addf %228, %237 : vector<8x16xf32>
    %c23 = arith.constant 23 : index
    %239 = memref.load %arg7[%c23] : memref<32xf32, #tpu.memory_space<smem>>
    %240 = vector.extract_strided_slice %3 {offsets = [0, 23], sizes = [8, 1], strides = [1, 1]} : vector<8x32xf32> to vector<8x1xf32>
    %241 = vector.extract_strided_slice %7 {offsets = [23, 0], sizes = [1, 16], strides = [1, 1]} : vector<32x16xf32> to vector<1x16xf32>
    %242 = vector.broadcast %240 : vector<8x1xf32> to vector<8x16xf32>
    %243 = vector.broadcast %241 : vector<1x16xf32> to vector<8x16xf32>
    %244 = arith.addf %242, %243 : vector<8x16xf32>
    %245 = math.tanh %244 : vector<8x16xf32>
    %246 = vector.broadcast %239 : f32 to vector<8x16xf32>
    %247 = arith.mulf %246, %245 : vector<8x16xf32>
    %248 = arith.addf %238, %247 : vector<8x16xf32>
    %c24 = arith.constant 24 : index
    %249 = memref.load %arg7[%c24] : memref<32xf32, #tpu.memory_space<smem>>
    %250 = vector.extract_strided_slice %3 {offsets = [0, 24], sizes = [8, 1], strides = [1, 1]} : vector<8x32xf32> to vector<8x1xf32>
    %251 = vector.extract_strided_slice %7 {offsets = [24, 0], sizes = [1, 16], strides = [1, 1]} : vector<32x16xf32> to vector<1x16xf32>
    %252 = vector.broadcast %250 : vector<8x1xf32> to vector<8x16xf32>
    %253 = vector.broadcast %251 : vector<1x16xf32> to vector<8x16xf32>
    %254 = arith.addf %252, %253 : vector<8x16xf32>
    %255 = math.tanh %254 : vector<8x16xf32>
    %256 = vector.broadcast %249 : f32 to vector<8x16xf32>
    %257 = arith.mulf %256, %255 : vector<8x16xf32>
    %258 = arith.addf %248, %257 : vector<8x16xf32>
    %c25 = arith.constant 25 : index
    %259 = memref.load %arg7[%c25] : memref<32xf32, #tpu.memory_space<smem>>
    %260 = vector.extract_strided_slice %3 {offsets = [0, 25], sizes = [8, 1], strides = [1, 1]} : vector<8x32xf32> to vector<8x1xf32>
    %261 = vector.extract_strided_slice %7 {offsets = [25, 0], sizes = [1, 16], strides = [1, 1]} : vector<32x16xf32> to vector<1x16xf32>
    %262 = vector.broadcast %260 : vector<8x1xf32> to vector<8x16xf32>
    %263 = vector.broadcast %261 : vector<1x16xf32> to vector<8x16xf32>
    %264 = arith.addf %262, %263 : vector<8x16xf32>
    %265 = math.tanh %264 : vector<8x16xf32>
    %266 = vector.broadcast %259 : f32 to vector<8x16xf32>
    %267 = arith.mulf %266, %265 : vector<8x16xf32>
    %268 = arith.addf %258, %267 : vector<8x16xf32>
    %c26 = arith.constant 26 : index
    %269 = memref.load %arg7[%c26] : memref<32xf32, #tpu.memory_space<smem>>
    %270 = vector.extract_strided_slice %3 {offsets = [0, 26], sizes = [8, 1], strides = [1, 1]} : vector<8x32xf32> to vector<8x1xf32>
    %271 = vector.extract_strided_slice %7 {offsets = [26, 0], sizes = [1, 16], strides = [1, 1]} : vector<32x16xf32> to vector<1x16xf32>
    %272 = vector.broadcast %270 : vector<8x1xf32> to vector<8x16xf32>
    %273 = vector.broadcast %271 : vector<1x16xf32> to vector<8x16xf32>
    %274 = arith.addf %272, %273 : vector<8x16xf32>
    %275 = math.tanh %274 : vector<8x16xf32>
    %276 = vector.broadcast %269 : f32 to vector<8x16xf32>
    %277 = arith.mulf %276, %275 : vector<8x16xf32>
    %278 = arith.addf %268, %277 : vector<8x16xf32>
    %c27 = arith.constant 27 : index
    %279 = memref.load %arg7[%c27] : memref<32xf32, #tpu.memory_space<smem>>
    %280 = vector.extract_strided_slice %3 {offsets = [0, 27], sizes = [8, 1], strides = [1, 1]} : vector<8x32xf32> to vector<8x1xf32>
    %281 = vector.extract_strided_slice %7 {offsets = [27, 0], sizes = [1, 16], strides = [1, 1]} : vector<32x16xf32> to vector<1x16xf32>
    %282 = vector.broadcast %280 : vector<8x1xf32> to vector<8x16xf32>
    %283 = vector.broadcast %281 : vector<1x16xf32> to vector<8x16xf32>
    %284 = arith.addf %282, %283 : vector<8x16xf32>
    %285 = math.tanh %284 : vector<8x16xf32>
    %286 = vector.broadcast %279 : f32 to vector<8x16xf32>
    %287 = arith.mulf %286, %285 : vector<8x16xf32>
    %288 = arith.addf %278, %287 : vector<8x16xf32>
    %c28 = arith.constant 28 : index
    %289 = memref.load %arg7[%c28] : memref<32xf32, #tpu.memory_space<smem>>
    %290 = vector.extract_strided_slice %3 {offsets = [0, 28], sizes = [8, 1], strides = [1, 1]} : vector<8x32xf32> to vector<8x1xf32>
    %291 = vector.extract_strided_slice %7 {offsets = [28, 0], sizes = [1, 16], strides = [1, 1]} : vector<32x16xf32> to vector<1x16xf32>
    %292 = vector.broadcast %290 : vector<8x1xf32> to vector<8x16xf32>
    %293 = vector.broadcast %291 : vector<1x16xf32> to vector<8x16xf32>
    %294 = arith.addf %292, %293 : vector<8x16xf32>
    %295 = math.tanh %294 : vector<8x16xf32>
    %296 = vector.broadcast %289 : f32 to vector<8x16xf32>
    %297 = arith.mulf %296, %295 : vector<8x16xf32>
    %298 = arith.addf %288, %297 : vector<8x16xf32>
    %c29 = arith.constant 29 : index
    %299 = memref.load %arg7[%c29] : memref<32xf32, #tpu.memory_space<smem>>
    %300 = vector.extract_strided_slice %3 {offsets = [0, 29], sizes = [8, 1], strides = [1, 1]} : vector<8x32xf32> to vector<8x1xf32>
    %301 = vector.extract_strided_slice %7 {offsets = [29, 0], sizes = [1, 16], strides = [1, 1]} : vector<32x16xf32> to vector<1x16xf32>
    %302 = vector.broadcast %300 : vector<8x1xf32> to vector<8x16xf32>
    %303 = vector.broadcast %301 : vector<1x16xf32> to vector<8x16xf32>
    %304 = arith.addf %302, %303 : vector<8x16xf32>
    %305 = math.tanh %304 : vector<8x16xf32>
    %306 = vector.broadcast %299 : f32 to vector<8x16xf32>
    %307 = arith.mulf %306, %305 : vector<8x16xf32>
    %308 = arith.addf %298, %307 : vector<8x16xf32>
    %c30 = arith.constant 30 : index
    %309 = memref.load %arg7[%c30] : memref<32xf32, #tpu.memory_space<smem>>
    %310 = vector.extract_strided_slice %3 {offsets = [0, 30], sizes = [8, 1], strides = [1, 1]} : vector<8x32xf32> to vector<8x1xf32>
    %311 = vector.extract_strided_slice %7 {offsets = [30, 0], sizes = [1, 16], strides = [1, 1]} : vector<32x16xf32> to vector<1x16xf32>
    %312 = vector.broadcast %310 : vector<8x1xf32> to vector<8x16xf32>
    %313 = vector.broadcast %311 : vector<1x16xf32> to vector<8x16xf32>
    %314 = arith.addf %312, %313 : vector<8x16xf32>
    %315 = math.tanh %314 : vector<8x16xf32>
    %316 = vector.broadcast %309 : f32 to vector<8x16xf32>
    %317 = arith.mulf %316, %315 : vector<8x16xf32>
    %318 = arith.addf %308, %317 : vector<8x16xf32>
    %c31 = arith.constant 31 : index
    %319 = memref.load %arg7[%c31] : memref<32xf32, #tpu.memory_space<smem>>
    %320 = vector.extract_strided_slice %3 {offsets = [0, 31], sizes = [8, 1], strides = [1, 1]} : vector<8x32xf32> to vector<8x1xf32>
    %321 = vector.extract_strided_slice %7 {offsets = [31, 0], sizes = [1, 16], strides = [1, 1]} : vector<32x16xf32> to vector<1x16xf32>
    %322 = vector.broadcast %320 : vector<8x1xf32> to vector<8x16xf32>
    %323 = vector.broadcast %321 : vector<1x16xf32> to vector<8x16xf32>
    %324 = arith.addf %322, %323 : vector<8x16xf32>
    %325 = math.tanh %324 : vector<8x16xf32>
    %326 = vector.broadcast %319 : f32 to vector<8x16xf32>
    %327 = arith.mulf %326, %325 : vector<8x16xf32>
    %328 = arith.addf %318, %327 : vector<8x16xf32>
    %c1_i32 = arith.constant 1 : i32
    %329 = arith.muli %arg0, %c1_i32 : i32
    %c0_i32 = arith.constant 0 : i32
    %330 = arith.addi %329, %c0_i32 : i32
    %331 = arith.index_cast %330 : i32 to index
    %332 = memref.load %arg1[%331] : memref<2xi32, #tpu.memory_space<smem>>
    %333 = tpu.iota {dimensions = array<i32: 1>} : vector<8x16xi32>
    %334 = vector.broadcast %332 : i32 to vector<8x16xi32>
    %335 = arith.cmpi slt, %333, %334 : vector<8x16xi32>
    %cst_12 = arith.constant -1.000000e+06 : f32
    %336 = vector.broadcast %cst_12 : f32 to vector<8x16xf32>
    %337 = arith.select %335, %328, %336 : vector<8x16xi1>, vector<8x16xf32>
    %cst_13 = arith.constant dense<0xFF800000> : vector<8xf32>
    %338 = vector.multi_reduction <maximumf>, %337, %cst_13 [1] : vector<8x16xf32> to vector<8xf32>
    %339 = vector.shape_cast %338 : vector<8xf32> to vector<8x1xf32>
    %340 = vector.broadcast %339 : vector<8x1xf32> to vector<8x16xf32>
    %341 = arith.subf %337, %340 : vector<8x16xf32>
    %342 = math.exp %341 : vector<8x16xf32>
    %cst_14 = arith.constant dense<0.000000e+00> : vector<8xf32>
    %343 = vector.multi_reduction <add>, %342, %cst_14 [1] : vector<8x16xf32> to vector<8xf32>
    %344 = vector.shape_cast %343 : vector<8xf32> to vector<8x1xf32>
    %345 = tpu.reciprocal %344 : vector<8x1xf32> -> vector<8x1xf32>
    %346 = vector.broadcast %345 : vector<8x1xf32> to vector<8x16xf32>
    %347 = arith.mulf %342, %346 : vector<8x16xf32>
    %c0_15 = arith.constant 0 : index
    %c0_16 = arith.constant 0 : index
    %c0_17 = arith.constant 0 : index
    %348 = vector.load %arg4[%c0_15, %c0_16, %c0_17] : memref<1x16x32xf32, #tpu.memory_space<vmem>>, vector<1x16x32xf32>
    %349 = vector.shape_cast %348 : vector<1x16x32xf32> to vector<16x32xf32>
    %cst_18 = arith.constant dense<0.000000e+00> : vector<8x32xf32>
    %350 = tpu.matmul %347, %349, %cst_18 {dimension_numbers = #tpu.dot_dimension_numbers<[1], [0], [0], [1], [0, 0, 1, 1], [], []>} : vector<8x16xf32>, vector<16x32xf32>, vector<8x32xf32> -> vector<8x32xf32>
    %c0_19 = arith.constant 0 : index
    %c0_20 = arith.constant 0 : index
    %c0_21 = arith.constant 0 : index
    %351 = vector.load %arg8[%c0_19, %c0_20, %c0_21] : memref<1x8x32xf32, #tpu.memory_space<vmem>>, vector<1x8x32xf32>
    %352 = vector.shape_cast %351 : vector<1x8x32xf32> to vector<8x32xf32>
    %353 = vector.shape_cast %350 : vector<8x32xf32> to vector<1x8x32xf32>
    tpu.vector_store %arg8[%c0_19, %c0_20, %c0_21], %353 {strides = array<i32>} : memref<1x8x32xf32, #tpu.memory_space<vmem>>, vector<1x8x32xf32>,
    return
  }
  func.func @transform_0(%arg0: i32, %arg1: memref<2xi32, #tpu.memory_space<smem>>) -> (i32, i32, i32) {
    %c0_i32 = arith.constant 0 : i32
    %c0_i32_0 = arith.constant 0 : i32
    %c0_i32_1 = arith.constant 0 : i32
    return %arg0, %c0_i32, %c0_i32_0 : i32, i32, i32
  }
  func.func @transform_1(%arg0: i32, %arg1: memref<2xi32, #tpu.memory_space<smem>>) -> (i32, i32, i32) {
    %c0_i32 = arith.constant 0 : i32
    %c0_i32_0 = arith.constant 0 : i32
    %c0_i32_1 = arith.constant 0 : i32
    return %arg0, %c0_i32, %c0_i32_0 : i32, i32, i32
  }
  func.func @transform_2(%arg0: i32, %arg1: memref<2xi32, #tpu.memory_space<smem>>) -> (i32, i32, i32) {
    %c0_i32 = arith.constant 0 : i32
    %c0_i32_0 = arith.constant 0 : i32
    %c0_i32_1 = arith.constant 0 : i32
    return %arg0, %c0_i32, %c0_i32_0 : i32, i32, i32
  }
  func.func @transform_3(%arg0: i32, %arg1: memref<2xi32, #tpu.memory_space<smem>>) -> (i32, i32) {
    %c0_i32 = arith.constant 0 : i32
    %c0_i32_0 = arith.constant 0 : i32
    %c0_i32_1 = arith.constant 0 : i32
    return %c0_i32, %c0_i32_0 : i32, i32
  }
  func.func @transform_4(%arg0: i32, %arg1: memref<2xi32, #tpu.memory_space<smem>>) -> (i32, i32) {
    %c0_i32 = arith.constant 0 : i32
    %c0_i32_0 = arith.constant 0 : i32
    %c0_i32_1 = arith.constant 0 : i32
    return %c0_i32, %c0_i32_0 : i32, i32
  }
  func.func @transform_5(%arg0: i32, %arg1: memref<2xi32, #tpu.memory_space<smem>>) -> i32 {
    %c0_i32 = arith.constant 0 : i32
    %c0_i32_0 = arith.constant 0 : i32
    return %c0_i32 : i32
  }
  func.func @transform_6(%arg0: i32, %arg1: memref<2xi32, #tpu.memory_space<smem>>) -> (i32, i32, i32) {
    %c0_i32 = arith.constant 0 : i32
    %c0_i32_0 = arith.constant 0 : i32
    %c0_i32_1 = arith.constant 0 : i32
    return %arg0, %c0_i32, %c0_i32_0 : i32, i32, i32
  }
}

</mosaic_0001>

<bundles_post_ra>
// kernel: tpu_custom_call.1
= control target key start
LH: loop header
LB: loop body
LE: loop exit
PB: predicated region body
PF: predicated region fallthrough
CT: control target
= control target key end

     0   :  { %s1325_s27 = smov [#allocation3]   ;;  %s1696_s0 = inlined_call_operand.hbm [shape: s32[2], index: 0, kind: input, shape index: {}]   ;;  %s1697_s1 = inlined_call_operand.hbm [shape: f32[2,8,32], index: 1, kind: input, shape index: {}]   ;;  %s1698_s2 = inlined_call_operand.vmem [shape: f32[2,32,16], index: 2, kind: input, shape index: {}]   ;;  %s1699_s3 = inlined_call_operand.vmem [shape: f32[2,16,32], index: 3, kind: input, shape index: {}]   ;;  %s1700_s4 = inlined_call_operand.vmem [shape: f32[32,32], index: 4, kind: input, shape index: {}]   ;;  %s1701_s5 = inlined_call_operand.vmem [shape: f32[32,32], index: 5, kind: input, shape index: {}]   ;;  %s1702_s6 = inlined_call_operand.vmem [shape: f32[32], index: 6, kind: input, shape index: {}]   ;;  %s1703_s7 = inlined_call_operand.hbm [shape: f32[2,8,32], index: 7, kind: output, shape index: {}]  }
   0x1   :  { %s13_s26 = sshll.u32 %s1696_s0, 4  ;;  %s14_s26 = int_to_ptr.hbm [resolvable:$true] %s13_s26 }
   0x2   :  { %16 = dma.hbm_to_smem %s14_s26, 16, %s1325_s27, [#allocation2] }
   0x3   :  { %1295 = dma.done.wait [#allocation2], 16 }
   0x4   :  { %1296 = vsyncadd [#allocation2], 4294967280 }
   0x5   :  { %19 = sfence }
   0x6   :  { %20 = vsyncpa [#allocation5], 0 }
   0x7   :  { %22 = vsyncpa [#allocation5 + $0x1], 0 }
   0x8   :  { %23 = vsyncpa [#allocation7], 0 }
   0x9   :  { %24 = vsyncpa [#allocation6], 0 }
   0xa   :  { %26 = vsyncpa [#allocation6 + $0x1], 0  ;;  %s1402_s28 = smov 0   ;;  %s1404_s29 = smov 0  }
   0xb   :  { %s1406_s30 = smov 0   ;;  %s1408_s8 = smov 0  }
   0xc LB: > { %s1423_s0 = sadd.s32 4294967295, %s1323_s8   ;;  %s942_s9 = sadd.s32 4294967294, %s1323_s8   ;;  %s1323_s8 = sphi %s1408_s8, %s1713_s8   ;;  %s1319_s30 = sphi %s1406_s30, %s1712_s30   ;;  %s1315_s29 = sphi %s1404_s29, %s1711_s29   ;;  %s1311_s28 = sphi %s1402_s28, %s1710_s28  }
   0xd   : > { %p52_p0 = scmp.ne.s32.totalorder %s1315_s29, %s1311_s28  ;;  %p53_p1 = scmp.eq.s32.totalorder %s1423_s0, 0 }
   0xe   : > { %p191_p2 = scmp.eq.s32.totalorder %s1423_s0, 1  ;;  %p197_p3 = scmp.eq.s32.totalorder %s942_s9, 1 }
   0xf   : > { %p1432_p4 = por %p53_p1, %p52_p0  ;;  %p943_p5 = scmp.ge.s32.totalorder %s1323_s8, 1 }
  0x10   : > { %p1437_p6 = por %p197_p3, %p52_p0  ;;  %p204_p7 = scmp.lt.s32.totalorder %s1323_s8, 3 }
  0x11   : > { %s222_s14 = sshll.u32 %s1702_s6, 4  ;;  %s1453_s16 = sadd.s32 1, %s1323_s8   ;;  %s223_s14 = int_to_ptr.vmem [resolvable:$true] %s222_s14 }
  0x12   : > { %p1445_p8 = pnand %p943_p5, %p204_p7  ;;  %s36_s17 = ssub.s32 %s1323_s8, %s1453_s16 }
  0x13   : > { %p37_p12 = scmp.eq.s32.totalorder %s36_s17, 0  ;;  %s39_s18 = sadd.s32 1, %s1319_s30 }
  0x14   : > { %p1011_p10 = pneg %p1445_p8  ;;  %p46_p13 = scmp.ne.s32.totalorder %s1319_s30, %s1315_s29 }
  0x15   : > { %s1326_s19 = smov [#allocation8]   ;;  %p47_p0 = scmp.eq.s32.totalorder %s1323_s8, 0 }
  0x16   : > { %p1012_p11 = pnand %p1011_p10, %p53_p1  ;;  %p1468_p3 = por %p191_p2, %p46_p13 }
  0x17   : > { %s1463_s20 = scalar_select %p37_p12, %s1319_s30, %s39_s18  }
  0x18   : > { %1014 = dma.vmem_to_smem (!%p1012_p11), %s223_s14, 16, %s1326_s19, [#allocation7]  }
  0x19   : > { %s233_s22 = sand.u32 1, %s1319_s30   ;;  %p48_p5 = por %p47_p0, %p46_p13 }
  0x1a   : > { %p1024_p7 = scmp.lt.s32.totalorder %s1323_s8, 2  ;;  %s946_s23 = sshll.u32 %s233_s22, 3 }
  0x1b   : > { %s947_s24 = sshll.u32 %s1323_s8, 3  ;;  %s237_s12 = scalar_lea.vmem [#allocation4], %s946_s23 }
  0x1c   : > { %s241_s27 = scalar_lea.hbm %s1697_s1, %s947_s24  ;;  %s245_s13 = sshll.u32 %s237_s12, 4  ;;  %s246_s13 = int_to_ptr.vmem [resolvable:$true] %s245_s13 }
  0x1d   : > { %s243_s9 = sshll.u32 %s241_s27, 4  ;;  %p1478_p10 = pnand %p1024_p7, %p48_p5  ;;  %s244_s9 = int_to_ptr.hbm [resolvable:$true] %s243_s9 }
  0x1e   : > { %s234_s17 = scalar_lea.sflag [#allocation5], %s233_s22  ;;  %s1221_s18 = sshra.s32 %s244_s9, 4  ;;  %s1222_s18 = int_to_ptr.hbm [resolvable:$true] %s1221_s18 }
  0x1f   : > { %s1223_s19 = scalar_lea.hbm %s1222_s18, 8  ;;  %p1225_p11 = pneg %p1478_p10 }
  0x20   : > { %p1224_p2 = scmp.ne.s32.totalorder %s1222_s18, %s1223_s19  ;;  %s1228_s23 = scalar_lea.hbm %s1697_s1, 16 }
  0x21   : > { %p1229_p0 = scmp.lt.s32.totalorder %s1222_s18, %s1697_s1  ;;  %p1230_p5 = scmp.lt.s32.totalorder %s1228_s23, %s1223_s19 }
  0x22   : > { %p1226_p12 = pnand %p1225_p11, %p1224_p2 }
  0x23   : > { %p1231_p7 = por %p1230_p5, %p1229_p0 }
  0x24   : > { %p1227_p13 = pneg %p1226_p12 }
  0x26   : > { %p1232_p9 = pnand %p1231_p7, %p1227_p13 }
  0x28   : > { %1235 = shalt.err (!%p1232_p9)
}
  0x29   : > { %1018 = dma.hbm_to_vmem [thread:$0]  (!%p1478_p10), %s244_s9, 128, %s246_s13, %s234_s17  }
  0x2a   : > { %270 = sbr.rel (%p1445_p8) target bundleno = 825 (0x339), region = 44  ;;  %s1495_s22 = sand.u32 (!%p1445_p8), 1, %s1315_s29  }
  0x2b   : > { %s949_s12 = sshll.u32 (!%p1445_p8), %s1495_s22, 3  ;;  %s273_s24 = scalar_lea.sflag (!%p1445_p8), [#allocation5], %s1495_s22 }
  0x2c   : > { %s276_s18 = scalar_lea.vmem (!%p1445_p8), [#allocation4], %s949_s12 }
  0x2f   : > { %1298 = dma.done.wait (%p1432_p4), %s273_s24, 128  }
  0x30   : > { %1300 = vsyncadd (%p1432_p4), %s273_s24, 4294967168 }
  0x31   : > { %1302 = dma.done.wait (%p53_p1), [#allocation7], 16  }
  0x32   : > { %1304 = vsyncadd (%p53_p1), [#allocation7], 4294967280 }
  0x33   : > { %287 = sfence }
  0x34   : > { %v336_v0 = vld [vmem:[%s1700_s4 + $0x18] sm:$0xff]  ;;  %v335_v1 = vld [vmem:[%s1700_s4 + $0x10] sm:$0xff]  ;;  %p322_p8 = scmp.lt.s32.totalorder %s1423_s0, 1  ;;  %v1327_v2 = vmov 4   ;;  %v334_v3 = vld [vmem:[%s1700_s4 + $0x8] sm:$0xff]  ;;  %v1328_v4 = vmov 2  }
  0x35   : > { %353 = vmatpush.msra.mxu0 %v336_v0  ;;  %1097 = vset.pattern.permute.xlu2 %v1327_v2  ;;  %v1329_v5 = vmov 0   ;;  %v333_v6 = vld [vmem:[%s1700_s4] sm:$0xff]  ;;  %vm337_vm0 = vcmask 261120   ;;  %v362_v13 = vld [vmem:[%s1701_s5 + $0x8] sm:$0xff]  ;;  %v363_v14 = vld [vmem:[%s1701_s5 + $0x10] sm:$0xff]  ;;  %v1330_v17 = vmov 5  }
  0x36   : > { %s1520_s19 = scalar_select %p322_p8, %s1423_s0, 1  ;;  %1095 = vset.pattern.permute.xlu1 %v1328_v4  ;;  %1093 = vset.pattern.permute.xlu0 %v1329_v5  ;;  %v332_v7 = vld [vmem:[%s276_s18] sm:$0xff]  ;;  %v364_v16 = vld [vmem:[%s1701_s5 + $0x18] sm:$0xff]  ;;  %v1331_v18 = vmov 3   ;;  %v1332_v19 = vmov 1   ;;  %v1333_v20 = vmov 7  }
  0x37   : > { %354 = vmatpush.msra.mxu0 %v335_v1  ;;  %v361_v12 = vld [vmem:[%s1701_s5] sm:$0xff]  ;;  %v1334_v21 = vmov 6   ;;  %v1335_v22 = vmov 8   ;;  %v1336_v23 = vmov 10   ;;  %v1337_v24 = vmov 9   ;;  %s961_s27 = sld [smem:[#allocation8 + $0x1]] }
  0x38   : > { %s997_s26 = sshll.u32 %s1520_s19, 5  ;;  %v1338_v25 = vmov 13   ;;  %v1339_v26 = vmov 12   ;;  %v1340_v27 = vmov 11   ;;  %v1341_v28 = vmov 18   ;;  %s962_s24 = sld [smem:[#allocation8 + $0x2]] }
  0x39   : > { %355 = vmatpush.msra.mxu0 %v334_v3  ;;  %s326_s15 = scalar_lea.vmem %s1698_s2, %s997_s26  ;;  %v1342_v29 = vmov 15   ;;  %v1343_v30 = vmov 14   ;;  %v1344_v31 = vmov 23   ;;  %v1345_v32 = vmov 17   ;;  %s410_s26 = sld [smem:[#allocation8]] }
  0x3a   : > { %v368_v8 = vld [vmem:[%s326_s15 + $0x18] sm:$0xff]  ;;  %v367_v9 = vld [vmem:[%s326_s15 + $0x10] sm:$0xff]  ;;  %v366_v10 = vld [vmem:[%s326_s15 + $0x8] sm:$0xff]  ;;  %v1346_v33 = vmov 16   ;;  %v1347_v34 = vmov 28   ;;  %v1348_v35 = vmov 20  }
  0x3b   : > { %356 = vmatpush.msra.mxu0 %v333_v6  ;;  %393 = vmatpush.msra.mxu1 %v368_v8  ;;  %v365_v11 = vld [vmem:[%s326_s15] sm:$0xff]  ;;  %v1349_v36 = vmov 19   ;;  %v1350_v37 = vmov 22   ;;  %v1351_v38 = vmov 21   ;;  %v1352_v39 = vmov 31   ;;  %s963_s15 = sld [smem:[#allocation8 + $0x3]] }
  0x3c   : > { %956 = vmatmul.msk.f32.vlgmr.msra.gmra.mxu0 %vm337_vm0, %v332_v7  ;;  %999 = vmatpush.msra.mxu3 %v368_v8  ;;  %v1353_v40 = vmov 25   ;;  %v1354_v41 = vmov 24   ;;  %v1355_v42 = vmov 27   ;;  %v1356_v43 = vmov 26   ;;  %s964_s9 = sld [smem:[#allocation8 + $0x4]] }
  0x3d   : > { %394 = vmatpush.msra.mxu1 %v367_v9  ;;  %v1357_v44 = vmov 30   ;;  %v1358_v45 = vmov 29   ;;  %v430_v1 = vstv %s961_s27  ;;  %s965_s13 = sld [smem:[#allocation8 + $0x5]]  ;;  %vm769_vm2 = vcmask 130048  }
  0x3e   : > { %1000 = vmatpush.msra.mxu3 %v367_v9  ;;  %v441_v9 = vstv %s962_s24  ;;  %s966_s18 = sld [smem:[#allocation8 + $0x6]] }
  0x3f   : > { %395 = vmatpush.msra.mxu1 %v366_v10  ;;  %v419_v0 = vstv %s410_s26  ;;  %s967_s14 = sld [smem:[#allocation8 + $0x7]] }
  0x40   : > { %1001 = vmatpush.msra.mxu3 %v366_v10  ;;  %s968_s10 = sld [smem:[#allocation8 + $0x8]] }
  0x41   : > { %396 = vmatpush.msra.mxu1 %v365_v11  ;;  %s969_s17 = sld [smem:[#allocation8 + $0x9]] }
  0x42   : > { %957 = vmatmul.msk.f32.vlgmr.msra.gmra.mxu1 %vm337_vm0, %v361_v12  ;;  %1002 = vmatpush.msra.mxu3 %v365_v11  ;;  %s1586_s25 = sld [smem:[#allocation8 + $0xa]] }
  0x43   : > { %959 = vmatmul.msk.f32.vlgmr.msra.gmra.mxu3 %vm337_vm0, %v363_v14  ;;  %s1589_s23 = sld [smem:[#allocation8 + $0xb]] }
  0x44   : > { %s1593_s26 = sld [smem:[#allocation8 + $0xc]] }
  0x45   : > { %s1598_s27 = sld [smem:[#allocation8 + $0xd]] }
  0x46   : > { %s974_s24 = sld [smem:[#allocation8 + $0xe]] }
  0x4a   : > { %958 = vmatmul.msk.f32.gmra.mxu1 %vm337_vm0, %v362_v13 }
  0x4b   : > { %960 = vmatmul.msk.f32.gmra.mxu3 %vm337_vm0, %v364_v16  ;;  %v452_v16 = vstv %s963_s15  ;;  %s1604_s15 = sld [smem:[#allocation8 + $0xf]] }
  0xb9   : > { %v1542_v15 = vpop.f32.mrf.mxu0 }
  0xba   : > { %457 = vperm.xlu2 %1097, %v1542_v15   ;;  %435 = vperm.xlu1 %1095, %v1542_v15  }
  0xbb   : > { %413 = vperm.xlu0 %1093, %v1542_v15  }
  0xbf   : > { %v398_v49 = vpop.f32.mrf.mxu1 }
  0xc0   : > { %v416_v51 = vperm.slane %v398_v49, 0  ;;  %v427_v52 = vperm.slane %v398_v49, 1  ;;  %v438_v53 = vperm.slane %v398_v49, 2  ;;  %v449_v59 = vperm.slane %v398_v49, 3 }
  0xc1   : > { %v460_v61 = vperm.slane %v398_v49, 4  ;;  %v471_v5 = vperm.slane %v398_v49, 5  ;;  %v482_v10 = vperm.slane %v398_v49, 6 }
  0xc2   : > { %1098 = vset.pattern.permute.xlu2 %v1330_v17  ;;  %1096 = vset.pattern.permute.xlu1 %v1331_v18 }
  0xc3   : > { %1094 = vset.pattern.permute.xlu0 %v1332_v19  ;;  %468 = vperm.xlu2 %1098, %v1542_v15   ;;  %v493_v19 = vperm.slane %v398_v49, 7 }
  0xc4   : > { %446 = vperm.xlu1 %1096, %v1542_v15   ;;  %424 = vperm.xlu0 %1094, %v1542_v15  }
  0xcb   : > { %1100 = vset.pattern.permute.xlu2 %v1333_v20 }
  0xcc   : > { %1099 = vset.pattern.permute.xlu1 %v1334_v21  ;;  %1101 = vset.pattern.permute.xlu0 %v1335_v22 }
  0xcd   : > { %490 = vperm.xlu2 %1100, %v1542_v15   ;;  %479 = vperm.xlu1 %1099, %v1542_v15  }
  0xce   : > { %501 = vperm.xlu0 %1101, %v1542_v15  }
  0xd5   : > { %1103 = vset.pattern.permute.xlu2 %v1336_v23  ;;  %1102 = vset.pattern.permute.xlu1 %v1337_v24  ;;  %v463_v23 = vstv %s964_s9  ;;  %v1580_v24 = vpop.f32.mrf.mxu1  ;;  %s1607_s9 = sld [smem:[#allocation8 + $0x10]] }
  0xd6   : > { %1106 = vset.pattern.permute.xlu0 %v1338_v25  ;;  %523 = vperm.xlu2 %1103, %v1542_v15  }
  0xd7   : > { %512 = vperm.xlu1 %1102, %v1542_v15   ;;  %556 = vperm.xlu0 %1106, %v1542_v15  }
  0xde   : > { %1105 = vset.pattern.permute.xlu2 %v1339_v26  ;;  %v504_v26 = vperm.slane %v1580_v24, 0 }
  0xdf   : > { %1104 = vset.pattern.permute.xlu1 %v1340_v27  ;;  %1111 = vset.pattern.permute.xlu0 %v1341_v28 }
  0xe0   : > { %545 = vperm.xlu2 %1105, %v1542_v15   ;;  %534 = vperm.xlu1 %1104, %v1542_v15  }
  0xe1   : > { %611 = vperm.xlu0 %1111, %v1542_v15  }
  0xe8   : > { %1108 = vset.pattern.permute.xlu2 %v1342_v29  ;;  %1107 = vset.pattern.permute.xlu1 %v1343_v30  ;;  %v515_v29 = vperm.slane %v1580_v24, 1 }
  0xe9   : > { %1116 = vset.pattern.permute.xlu0 %v1344_v31  ;;  %578 = vperm.xlu2 %1108, %v1542_v15  }
  0xea   : > { %567 = vperm.xlu1 %1107, %v1542_v15   ;;  %666 = vperm.xlu0 %1116, %v1542_v15  }
  0xf1   : > { %1110 = vset.pattern.permute.xlu2 %v1345_v32 }
  0xf2   : > { %1109 = vset.pattern.permute.xlu1 %v1346_v33  ;;  %1121 = vset.pattern.permute.xlu0 %v1347_v34  ;;  %v474_v33 = vstv %s965_s13  ;;  %s1612_s13 = sld [smem:[#allocation8 + $0x11]] }
  0xf3   : > { %600 = vperm.xlu2 %1110, %v1542_v15   ;;  %589 = vperm.xlu1 %1109, %v1542_v15  }
  0xf4   : > { %721 = vperm.xlu0 %1121, %v1542_v15  }
  0xfb   : > { %1113 = vset.pattern.permute.xlu2 %v1348_v35  ;;  %1112 = vset.pattern.permute.xlu1 %v1349_v36 }
  0xfc   : > { %633 = vperm.xlu2 %1113, %v1542_v15   ;;  %622 = vperm.xlu1 %1112, %v1542_v15  }
  0xfd   : > { %1125 = vset.pattern.permute.xlu0 %v1352_v39 }
 0x104   : > { %1115 = vset.pattern.permute.xlu2 %v1350_v37  ;;  %1114 = vset.pattern.permute.xlu1 %v1351_v38  ;;  %v485_v37 = vstv %s966_s18  ;;  %s1616_s18 = sld [smem:[#allocation8 + $0x12]] }
 0x105   : > { %655 = vperm.xlu2 %1115, %v1542_v15   ;;  %644 = vperm.xlu1 %1114, %v1542_v15  }
 0x10d   : > { %1118 = vset.pattern.permute.xlu2 %v1353_v40  ;;  %1117 = vset.pattern.permute.xlu1 %v1354_v41  ;;  %v526_v40 = vperm.slane %v1580_v24, 2 }
 0x10e   : > { %688 = vperm.xlu2 %1118, %v1542_v15   ;;  %677 = vperm.xlu1 %1117, %v1542_v15  }
 0x114   : > { %v458_v46 = vpop.permute.xlu2 %457 }
 0x115   : > { %v461_v4 = vadd.f32 %v460_v61, %v458_v46 }
 0x116   : > { %1120 = vset.pattern.permute.xlu2 %v1355_v42  ;;  %1119 = vset.pattern.permute.xlu1 %v1356_v43  ;;  %v537_v42 = vperm.slane %v1580_v24, 3 }
 0x117   : > { %710 = vperm.xlu2 %1120, %v1542_v15   ;;  %699 = vperm.xlu1 %1119, %v1542_v15  }
 0x11d   : > { %v469_v50 = vpop.permute.xlu2 %468 }
 0x11e   : > { %v472_v13 = vadd.f32 %v471_v5, %v469_v50  ;;  %v529_v5 = vstv %s1586_s25  ;;  %s982_s25 = sld [smem:[#allocation8 + $0x16]] }
 0x11f   : > { %1123 = vset.pattern.permute.xlu2 %v1357_v44  ;;  %1122 = vset.pattern.permute.xlu1 %v1358_v45 }
 0x120   : > { %743 = vperm.xlu2 %1123, %v1542_v15   ;;  %732 = vperm.xlu1 %1122, %v1542_v15  }
 0x127   : > { %v491_v60 = vpop.permute.xlu2 %490 }
 0x128   : > { %1124 = vset.pattern.permute.xlu1 %v1352_v39  ;;  %v494_v27 = vadd.f32 %v493_v19, %v491_v60  ;;  %v551_v19 = vstv %s1593_s26  ;;  %s984_s26 = sld [smem:[#allocation8 + $0x18]] }
 0x129   : > { %754 = vperm.xlu1 %1124, %v1542_v15  }
 0x12c   : > { %v436_v47 = vpop.permute.xlu1 %435 }
 0x12d   : > { %v414_v48 = vpop.permute.xlu0 %413  ;;  %v439_v58 = vadd.f32 %v438_v53, %v436_v47  ;;  %v496_v47 = vstv %s967_s14  ;;  %s979_s14 = sld [smem:[#allocation8 + $0x13]] }
 0x12e   : > { %v417_v54 = vadd.f32 %v416_v51, %v414_v48  ;;  %v548_v51 = vperm.slane %v1580_v24, 4 }
 0x130   : > { %1126 = vtanh.f32 %v417_v54  ;;  %v524_v11 = vpop.permute.xlu2 %523 }
 0x131   : > { %v527_v45 = vadd.f32 %v526_v40, %v524_v11 }
 0x136   : > { %v447_v55 = vpop.permute.xlu1 %446  ;;  %v425_v56 = vpop.permute.xlu0 %424 }
 0x137   : > { %v428_v57 = vadd.f32 %v427_v52, %v425_v56  ;;  %v450_v62 = vadd.f32 %v449_v59, %v447_v55  ;;  %v1127_v63 = vpop.eup %1126  ;;  %v507_v55 = vstv %s968_s10  ;;  %v518_v56 = vstv %s969_s17  ;;  %s1621_s10 = sld [smem:[#allocation8 + $0x14]] }
 0x138   : > { %v420_v6 = vmul.f32 %v1127_v63, %v419_v0  ;;  %s1624_s17 = sld [smem:[#allocation8 + $0x15]] }
 0x139   : > { %1128 = vtanh.f32 %v428_v57 }
 0x13a   : > { %1130 = vtanh.f32 %v439_v58  ;;  %v546_v31 = vpop.permute.xlu2 %545  ;;  %v559_v58 = vperm.slane %v1580_v24, 5 }
 0x13b   : > { %1132 = vtanh.f32 %v450_v62  ;;  %v549_v59 = vadd.f32 %v548_v51, %v546_v31  ;;  %v570_v62 = vperm.slane %v1580_v24, 6 }
 0x13c   : > { %1134 = vtanh.f32 %v461_v4 }
 0x13d   : > { %1136 = vtanh.f32 %v472_v13 }
 0x13f   : > { %v480_v2 = vpop.permute.xlu1 %479  ;;  %v1129_v3 = vpop.eup %1128 }
 0x140   : > { %v431_v7 = vmul.f32 %v1129_v3, %v430_v1  ;;  %v1131_v8 = vpop.eup %1130  ;;  %v483_v17 = vadd.f32 %v482_v10, %v480_v2  ;;  %v502_v28 = vpop.permute.xlu0 %501 }
 0x141   : > { %v442_v14 = vmul.f32 %v1131_v8, %v441_v9  ;;  %v1133_v15 = vpop.eup %1132  ;;  %v505_v35 = vadd.f32 %v504_v26, %v502_v28  ;;  %v581_v8 = vperm.slane %v1580_v24, 7  ;;  %v1600_v10 = vpop.f32.mrf.mxu3  ;;  %v562_v26 = vstv %s1598_s27  ;;  %s1637_s27 = sld [smem:[#allocation8 + $0x19]] }
 0x142   : > { %v432_v12 = vadd.f32 %v431_v7, %v420_v6  ;;  %v453_v20 = vmul.f32 %v1133_v15, %v452_v16  ;;  %v1135_v22 = vpop.eup %1134  ;;  %1138 = vtanh.f32 %v483_v17  ;;  %v540_v6 = vstv %s1589_s23  ;;  %s1633_s23 = sld [smem:[#allocation8 + $0x17]] }
 0x143   : > { %v464_v30 = vmul.f32 %v1135_v22, %v463_v23  ;;  %v1137_v32 = vpop.eup %1136  ;;  %1140 = vtanh.f32 %v494_v27  ;;  %v579_v50 = vpop.permute.xlu2 %578  ;;  %v603_v22 = vperm.slane %v1600_v10, 1  ;;  %v573_v27 = vstv %s974_s24  ;;  %s1640_s24 = sld [smem:[#allocation8 + $0x1a]] }
 0x144   : > { %v443_v18 = vadd.f32 %v442_v14, %v432_v12  ;;  %v475_v39 = vmul.f32 %v1137_v32, %v474_v33  ;;  %1142 = vtanh.f32 %v505_v35  ;;  %v592_v12 = vperm.slane %v1600_v10, 0 }
 0x145   : > { %v582_v15 = vadd.f32 %v581_v8, %v579_v50  ;;  %v625_v33 = vperm.slane %v1600_v10, 3 }
 0x146   : > { %v454_v25 = vadd.f32 %v453_v20, %v443_v18 }
 0x148   : > { %v465_v34 = vadd.f32 %v464_v30, %v454_v25  ;;  %v1139_v36 = vpop.eup %1138 }
 0x149   : > { %v513_v21 = vpop.permute.xlu1 %512  ;;  %v486_v44 = vmul.f32 %v1139_v36, %v485_v37  ;;  %v1141_v46 = vpop.eup %1140 }
 0x14a   : > { %v516_v38 = vadd.f32 %v515_v29, %v513_v21  ;;  %v476_v43 = vadd.f32 %v475_v39, %v465_v34  ;;  %v1143_v52 = vpop.eup %1142  ;;  %v497_v53 = vmul.f32 %v1141_v46, %v496_v47  ;;  %v557_v60 = vpop.permute.xlu0 %556  ;;  %v614_v29 = vperm.slane %v1600_v10, 2 }
 0x14b   : > { %v508_v63 = vmul.f32 %v1143_v52, %v507_v55  ;;  %v560_v3 = vadd.f32 %v559_v58, %v557_v60 }
 0x14c   : > { %1144 = vtanh.f32 %v516_v38  ;;  %v487_v49 = vadd.f32 %v486_v44, %v476_v43  ;;  %v636_v44 = vperm.slane %v1600_v10, 4 }
 0x14d   : > { %1146 = vtanh.f32 %v527_v45  ;;  %v601_v11 = vpop.permute.xlu2 %600 }
 0x14e   : > { %v498_v57 = vadd.f32 %v497_v53, %v487_v49  ;;  %v604_v31 = vadd.f32 %v603_v22, %v601_v11  ;;  %v606_v53 = vstv %s1612_s13  ;;  %v661_v22 = vstv %s982_s25  ;;  %s989_s13 = sld [smem:[#allocation8 + $0x1d]] }
 0x150   : > { %v509_v2 = vadd.f32 %v508_v63, %v498_v57  ;;  %v669_v63 = vperm.slane %v1600_v10, 7 }
 0x152   : > { %v535_v41 = vpop.permute.xlu1 %534  ;;  %v1145_v54 = vpop.eup %1144 }
 0x153   : > { %v538_v48 = vadd.f32 %v537_v42, %v535_v41  ;;  %v519_v0 = vmul.f32 %v1145_v54, %v518_v56  ;;  %v1147_v1 = vpop.eup %1146  ;;  %v612_v32 = vpop.permute.xlu0 %611  ;;  %v584_v41 = vstv %s1604_s15  ;;  %v595_v42 = vstv %s1607_s9  ;;  %s987_s15 = sld [smem:[#allocation8 + $0x1b]] }
 0x154   : > { %v530_v13 = vmul.f32 %v1147_v1, %v529_v5  ;;  %v615_v38 = vadd.f32 %v614_v29, %v612_v32  ;;  %v658_v56 = vperm.slane %v1600_v10, 6  ;;  %v672_v32 = vstv %s1633_s23  ;;  %s1646_s9 = sld [smem:[#allocation8 + $0x1c]]  ;;  %s1271_s23 = scalar_lea.hbm %s1703_s7, 16 }
 0x155   : > { %1148 = vtanh.f32 %v538_v48  ;;  %v520_v9 = vadd.f32 %v519_v0, %v509_v2  ;;  %v647_v48 = vperm.slane %v1600_v10, 5 }
 0x156   : > { %1150 = vtanh.f32 %v549_v59  ;;  %v634_v30 = vpop.permute.xlu2 %633 }
 0x157   : > { %1152 = vtanh.f32 %v560_v3  ;;  %v531_v16 = vadd.f32 %v530_v13, %v520_v9  ;;  %v637_v49 = vadd.f32 %v636_v44, %v634_v30  ;;  %v1628_v3 = vpop.f32.mrf.mxu3  ;;  %v639_v13 = vstv %s1621_s10  ;;  %s763_s10 = sld [smem:[#allocation3 + %s1423_s0]] }
 0x158   : > { %v694_v44 = vstv %s1637_s27 }
 0x15b   : > { %v1149_v4 = vpop.eup %1148 }
 0x15c   : > { %v568_v61 = vpop.permute.xlu1 %567  ;;  %v541_v14 = vmul.f32 %v1149_v4, %v540_v6  ;;  %v1151_v18 = vpop.eup %1150  ;;  %v680_v6 = vperm.slane %v1628_v3, 0 }
 0x15d   : > { %v571_v7 = vadd.f32 %v570_v62, %v568_v61  ;;  %v1153_v23 = vpop.eup %1152  ;;  %v552_v24 = vmul.f32 %v1151_v18, %v551_v19  ;;  %v617_v61 = vstv %s1616_s18  ;;  %v628_v62 = vstv %s979_s14  ;;  %v667_v1 = vpop.permute.xlu0 %666  ;;  %s990_s18 = sld [smem:[#allocation8 + $0x1e]] }
 0x15e   : > { %v542_v21 = vadd.f32 %v541_v14, %v531_v16  ;;  %v563_v34 = vmul.f32 %v1153_v23, %v562_v26  ;;  %v670_v8 = vadd.f32 %v669_v63, %v667_v1  ;;  %v650_v14 = vstv %s1624_s17  ;;  %s991_s14 = sld [smem:[#allocation8 + $0x1f]]  ;;  %s998_s17 = sshll.u32 %s1520_s19, 4 }
 0x15f   : > { %1154 = vtanh.f32 %v571_v7  ;;  %v656_v50 = vpop.permute.xlu2 %655  ;;  %v713_v26 = vperm.slane %v1628_v3, 3  ;;  %v738_v63 = vstv %s989_s13  ;;  %s994_s19 = sshll.u32 %s1423_s0, 3 }
 0x160   : > { %1156 = vtanh.f32 %v582_v15  ;;  %v553_v28 = vadd.f32 %v552_v24, %v542_v21  ;;  %v659_v2 = vadd.f32 %v658_v56, %v656_v50  ;;  %v702_v24 = vperm.slane %v1628_v3, 2 }
 0x162   : > { %v564_v39 = vadd.f32 %v563_v34, %v553_v28 }
 0x165   : > { %v590_v17 = vpop.permute.xlu1 %589  ;;  %v1155_v25 = vpop.eup %1154 }
 0x166   : > { %v593_v20 = vadd.f32 %v592_v12, %v590_v17  ;;  %v574_v35 = vmul.f32 %v1155_v25, %v573_v27  ;;  %v1157_v37 = vpop.eup %1156  ;;  %v691_v17 = vperm.slane %v1628_v3, 1 }
 0x167   : > { %v585_v46 = vmul.f32 %v1157_v37, %v584_v41 }
 0x168   : > { %1158 = vtanh.f32 %v593_v20  ;;  %v575_v45 = vadd.f32 %v574_v35, %v564_v39  ;;  %v689_v9 = vpop.permute.xlu2 %688  ;;  %v722_v39 = vpop.permute.xlu0 %721 }
 0x169   : > { %1160 = vtanh.f32 %v604_v31  ;;  %v692_v23 = vadd.f32 %v691_v17, %v689_v9 }
 0x16a   : > { %1162 = vtanh.f32 %v615_v38  ;;  %v586_v51 = vadd.f32 %v585_v46, %v575_v45  ;;  %v705_v45 = vstv %s1640_s24 }
 0x16e   : > { %v623_v36 = vpop.permute.xlu1 %622  ;;  %v1159_v40 = vpop.eup %1158 }
 0x16f   : > { %v626_v43 = vadd.f32 %v625_v33, %v623_v36  ;;  %v596_v47 = vmul.f32 %v1159_v40, %v595_v42  ;;  %v1161_v52 = vpop.eup %1160  ;;  %v683_v33 = vstv %s984_s26  ;;  %v724_v36 = vperm.slane %v1628_v3, 4  ;;  %s331_s26 = scalar_lea.vmem %s1699_s3, %s998_s17 }
 0x170   : > { %v1163_v58 = vpop.eup %1162  ;;  %v607_v59 = vmul.f32 %v1161_v52, %v606_v53 }
 0x171   : > { %1164 = vtanh.f32 %v626_v43  ;;  %v597_v54 = vadd.f32 %v596_v47, %v586_v51  ;;  %v618_v4 = vmul.f32 %v1163_v58, %v617_v61  ;;  %v711_v29 = vpop.permute.xlu2 %710  ;;  %v725_v43 = vadd.f32 %v724_v36, %v722_v39 }
 0x172   : > { %1166 = vtanh.f32 %v637_v49  ;;  %v714_v37 = vadd.f32 %v713_v26, %v711_v29  ;;  %v735_v47 = vperm.slane %v1628_v3, 5  ;;  %v746_v49 = vperm.slane %v1628_v3, 6 }
 0x173   : > { %v608_v0 = vadd.f32 %v607_v59, %v597_v54 }
 0x175   : > { %v619_v11 = vadd.f32 %v618_v4, %v608_v0  ;;  %v757_v0 = vperm.slane %v1628_v3, 7 }
 0x177   : > { %v645_v55 = vpop.permute.xlu1 %644  ;;  %v1165_v60 = vpop.eup %1164 }
 0x178   : > { %v648_v57 = vadd.f32 %v647_v48, %v645_v55  ;;  %v629_v5 = vmul.f32 %v1165_v60, %v628_v62  ;;  %v1167_v7 = vpop.eup %1166  ;;  %v727_v62 = vstv %s1646_s9  ;;  %s321_s9 = scalar_lea.vmem [#allocation9], %s949_s12 }
 0x179   : > { %v640_v18 = vmul.f32 %v1167_v7, %v639_v13  ;;  %s833_s13 = sshll.u32 %s321_s9, 4  ;;  %s834_s13 = int_to_ptr.vmem [resolvable:$true] %s833_s13 }
 0x17a   : > { %1168 = vtanh.f32 %v648_v57  ;;  %v630_v15 = vadd.f32 %v629_v5, %v619_v11  ;;  %v744_v52 = vpop.permute.xlu2 %743  ;;  %v716_v57 = vstv %s987_s15  ;;  %s831_s15 = scalar_lea.hbm %s1703_s7, %s994_s19 }
 0x17b   : > { %1170 = vtanh.f32 %v659_v2  ;;  %v747_v58 = vadd.f32 %v746_v49, %v744_v52 }
 0x17c   : > { %1172 = vtanh.f32 %v670_v8  ;;  %v641_v20 = vadd.f32 %v640_v18, %v630_v15  ;;  %v764_v8 = vlaneseq }
 0x180   : > { %v1169_v12 = vpop.eup %1168  ;;  %v678_v10 = vpop.permute.xlu1 %677 }
 0x181   : > { %v681_v16 = vadd.f32 %v680_v6, %v678_v10  ;;  %v651_v19 = vmul.f32 %v1169_v12, %v650_v14  ;;  %v1171_v21 = vpop.eup %1170  ;;  %v749_v12 = vstv %s990_s18  ;;  %v760_v14 = vstv %s991_s14  ;;  %s835_s18 = sshll.u32 %s831_s15, 4  ;;  %s821_s14 = scalar_lea.sflag [#allocation6], %s1495_s22  ;;  %s836_s18 = int_to_ptr.hbm [resolvable:$true] %s835_s18 }
 0x182   : > { %v1173_v27 = vpop.eup %1172  ;;  %v662_v28 = vmul.f32 %v1171_v21, %v661_v22  ;;  %v765_v10 = vand.u32 127, %v764_v8 }
 0x183   : > { %1174 = vtanh.f32 %v681_v16  ;;  %v652_v25 = vadd.f32 %v651_v19, %v641_v20  ;;  %v673_v38 = vmul.f32 %v1173_v27, %v672_v32  ;;  %v766_v16 = vstv %s763_s10  ;;  %v795_v27 = vld [vmem:[%s331_s26 + $0x8] sm:$0xff]  ;;  %s1265_s10 = sshra.s32 %s836_s18, 4  ;;  %s1266_s10 = int_to_ptr.hbm [resolvable:$true] %s1265_s10 }
 0x184   : > { %1176 = vtanh.f32 %v692_v23  ;;  %vm767_vm1 = vcmp.lt.s32.totalorder %v765_v10, %v766_v16  ;;  %813 = vmatpush.msra.mxu2 %v795_v27  ;;  %s1267_s17 = scalar_lea.hbm %s1266_s10, 8  ;;  %p1272_p10 = scmp.lt.s32.totalorder %s1266_s10, %s1703_s7 }
 0x185   : > { %v663_v35 = vadd.f32 %v662_v28, %v652_v25  ;;  %v794_v28 = vld [vmem:[%s331_s26] sm:$0xff]  ;;  %p1268_p1 = scmp.ne.s32.totalorder %s1266_s10, %s1267_s17  ;;  %p1273_p2 = scmp.lt.s32.totalorder %s1271_s23, %s1267_s17 }
 0x186   : > { %814 = vmatpush.msra.mxu2 %v794_v28 }
 0x187   : > { %v674_v41 = vadd.f32 %v673_v38, %v663_v35  ;;  %p1269_p4 = pnand %p1268_p1, %p1468_p3  ;;  %p1274_p11 = por %p1273_p2, %p1272_p10 }
 0x189   : > { %v700_v30 = vpop.permute.xlu1 %699  ;;  %v1175_v31 = vpop.eup %1174  ;;  %p1270_p9 = pneg %p1269_p4 }
 0x18a   : > { %v703_v34 = vadd.f32 %v702_v24, %v700_v30  ;;  %v684_v40 = vmul.f32 %v1175_v31, %v683_v33  ;;  %v1177_v42 = vpop.eup %1176 }
 0x18b   : > { %v695_v51 = vmul.f32 %v1177_v42, %v694_v44  ;;  %p1275_p12 = pnand %p1274_p11, %p1270_p9 }
 0x18c   : > { %1178 = vtanh.f32 %v703_v34  ;;  %v685_v46 = vadd.f32 %v684_v40, %v674_v41 }
 0x18d   : > { %1180 = vtanh.f32 %v714_v37 }
 0x18e   : > { %1182 = vtanh.f32 %v725_v43  ;;  %v696_v55 = vadd.f32 %v695_v51, %v685_v46 }
 0x192   : > { %v1179_v48 = vpop.eup %1178  ;;  %v733_v50 = vpop.permute.xlu1 %732 }
 0x193   : > { %v706_v53 = vmul.f32 %v1179_v48, %v705_v45  ;;  %v736_v54 = vadd.f32 %v735_v47, %v733_v50  ;;  %v1181_v56 = vpop.eup %1180 }
 0x194   : > { %v717_v60 = vmul.f32 %v1181_v56, %v716_v57  ;;  %v1183_v61 = vpop.eup %1182 }
 0x195   : > { %1184 = vtanh.f32 %v736_v54  ;;  %v707_v59 = vadd.f32 %v706_v53, %v696_v55  ;;  %v728_v6 = vmul.f32 %v1183_v61, %v727_v62 }
 0x196   : > { %1186 = vtanh.f32 %v747_v58 }
 0x197   : > { %v718_v4 = vadd.f32 %v717_v60, %v707_v59 }
 0x199   : > { %v729_v9 = vadd.f32 %v728_v6, %v718_v4 }
 0x19b   : > { %v1185_v1 = vpop.eup %1184  ;;  %v755_v2 = vpop.permute.xlu1 %754 }
 0x19c   : > { %v758_v5 = vadd.f32 %v757_v0, %v755_v2  ;;  %v739_v7 = vmul.f32 %v1185_v1, %v738_v63  ;;  %v1187_v11 = vpop.eup %1186 }
 0x19d   : > { %v750_v15 = vmul.f32 %v1187_v11, %v749_v12 }
 0x19e   : > { %1188 = vtanh.f32 %v758_v5  ;;  %v740_v13 = vadd.f32 %v739_v7, %v729_v9 }
 0x1a0   : > { %v751_v3 = vadd.f32 %v750_v15, %v740_v13 }
 0x1a4   : > { %v1189_v17 = vpop.eup %1188 }
 0x1a5   : > { %v761_v18 = vmul.f32 %v1189_v17, %v760_v14 }
 0x1a7   : > { %v762_v19 = vadd.f32 %v761_v18, %v751_v3 }
 0x1a9   : > { %v768_v20 = vsel %vm767_vm1, %v762_v19, -1000000.0 }
 0x1aa   : > { %v770_v21 = vsel %vm769_vm2, %v768_v20, -inf }
 0x1ab   : > { %771 = vmax.xlane.f32.xlu2 %v770_v21 }
 0x21e   : > { %v772_v22 = vpop.xlane.xlu2 %771 }
 0x21f   : > { %v773_v23 = vsub.f32 %v768_v20, %v772_v22 }
 0x221   : > { %v774_v24 = vmul.f32 1.442695, %v773_v23 }
 0x223   : > { %1190 = vpow2.f32 %v774_v24 }
 0x229   : > { %v1191_v25 = vpop.eup %1190 }
 0x22a   : > { %v776_v26 = vsel %vm769_vm2, %v1191_v25, 0.0 }
 0x22b   : > { %777 = vadd.xlane.f32.xlu0 %v776_v26 }
 0x29e   : > { %v778_v29 = vpop.xlane.xlu0 %777 }
 0x29f   : > { %1192 = vrcp.f32 %v778_v29  ;;  %v790_v33 = vand.u32 2147483648, %v778_v29  ;;  %v788_v35 = vand.u32 2147483647, %v778_v29  ;;  %vm784_vm4 = vweird.f32 %v778_v29 }
 0x2a1   : > { %v791_v37 = vor.u32 1.1754944e-38, %v790_v33  ;;  %vm789_vm6 = vcmp.eq.f32.partialorder %v788_v35, 8.507059e+37 }
 0x2a5   : > { %v1193_v30 = vpop.eup %1192 }
 0x2a6   : > { %v780_v31 = vmul.f32 %v1193_v30, %v778_v29  ;;  %vm785_vm3 = vweird.f32 %v1193_v30 }
 0x2a7   : > { %vm786_vm5 = vmor %vm784_vm4, %vm785_vm3 }
 0x2a8   : > { %v781_v32 = vsub.f32 1.0, %v780_v31 }
 0x2aa   : > { %v782_v34 = vmul.f32 %v1193_v30, %v781_v32 }
 0x2ac   : > { %v783_v36 = vadd.f32 %v1193_v30, %v782_v34 }
 0x2ae   : > { %v787_v38 = vsel %vm786_vm5, %v1193_v30, %v783_v36 }
 0x2af   : > { %v792_v39 = vsel %vm789_vm6, %v791_v37, %v787_v38 }
 0x2b0   : > { %v793_v40 = vmul.f32 %v1191_v25, %v792_v39 }
 0x2b2   : > { %992 = vmatmul.msk.f32.vlgmr.msra.gmra.mxu2 %vm769_vm2, %v793_v40 }
 0x335   : > { %v816_v41 = vpop.f32.mrf.mxu2 }
 0x336   : > { %819 = vst.msk [vmem:[%s321_s9] sm:$0xff] %vm337_vm0, %v816_v41 }
 0x337   : > { %1278 = shalt.err (!%p1275_p12)
}
 0x338   : > { %1009 = dma.vmem_to_hbm [thread:$0]  (%p1468_p3), %s834_s13, 128, %s836_s18, %s821_s14  }
 0x339 PF: > { %s847_s22 = sand.u32 1, %s1311_s28   ;;  %p1709_p13 = scmp.ge.s32.totalorder %s1323_s8, 2 }
 0x33a   : > { %s848_s19 = scalar_lea.sflag [#allocation6], %s847_s22 }
 0x33b   : > { %p1020_p0 = pnand %p1709_p13, %p1437_p6 }
 0x33d   : > { %p1021_p5 = pneg %p1020_p0 }
 0x33f   : > { %1306 = dma.done.wait (%p1021_p5), %s848_s19, 128  }
 0x340   : > { %1308 = vsyncadd (%p1021_p5), %s848_s19, 4294967168  ;;  %p29_p7 = scmp.ge.s32.totalorder %s1453_s16, 4   ;;  %s1710_s28 = smov %s1315_s29 }
 0x341   : > { %s1711_s29 = smov %s1319_s30  ;;  %s1712_s30 = smov %s1463_s20 }
 0x342   : > { %s1713_s8 = smov %s1453_s16  ;;  %31 = sbr.rel (!%p29_p7) target bundleno = 12 (0xc), region = 100 }
 0x347   :  { %854 = vsyncpa [#allocation5], 1 }
 0x348   :  { %856 = vsyncpa [#allocation5 + $0x1], 1 }
 0x349   :  { %857 = vsyncpa [#allocation6], 1 }
 0x34a   :  { %859 = vsyncpa [#allocation6 + $0x1], 1 }
 0x34b   :  { %860 = vsyncpa [#allocation7], 1 }
 0x34c   :  { %862 = vsyncpa [#allocation7 + $0x1], 1 }

</bundles_post_ra>
